<compile_context>
chip_gen: v5e
topology: v5e:2x2
jax: 0.10.0
libtpu: 0.0.40
codegen_flags: <defaults>
</compile_context>

<pallas_src>
import functools

import jax
import jax.numpy as jnp
from jax import lax
from jax.experimental import pallas as pl
from jax.experimental.pallas import tpu as pltpu


# ----------------------------------- kernel -----------------------------------
def sblock_kernel(H, xl_ref, xv_ref, m_ref, b_ref, o_ref):
    # Block shapes:
    #   xl/xv/o : (M, F)      with M = N*H (batch folded into rows), F = W*C
    #   m       : (2, 3F, F)  bf16, fused [kh=0; kh=1; kh=2] banded matrices
    #   b       : (2, 1, F)   f32 fused BN bias (tiled over W)
    M, F = xl_ref.shape

    x = xl_ref[...] + xv_ref[...]                       # (M, F) f32; also residual

    # Per-image row index: masks built once per step; (row % H) keeps the
    # sublane rolls from leaking across batch boundaries.
    rh = lax.broadcasted_iota(jnp.int32, (M, F), 0) % H
    mask_up = rh >= 1            # x[h-1] tap valid (zero first row of each image)
    mask_dn = rh <= H - 2        # x[h+1] tap valid (zero last  row of each image)

    def conv3x3(x_in, idx):
        # kh = 0 tap: x[h-1]  (sublane roll down by 1)
        x_up = jnp.where(mask_up, pltpu.roll(x_in, shift=1, axis=0), 0.0)
        # kh = 2 tap: x[h+1]  (sublane roll up by 1)
        x_dn = jnp.where(mask_dn, pltpu.roll(x_in, shift=M - 1, axis=0), 0.0)
        # One fused MXU matmul: (M, 3F) x (3F, F), bf16 operands, f32 accumulate.
        x_cat = jnp.concatenate([x_up, x_in, x_dn], axis=-1).astype(jnp.bfloat16)
        acc = jnp.dot(x_cat, m_ref[idx], preferred_element_type=jnp.float32)
        return acc + b_ref[idx]                          # (M, F) + (1, F)

    y = jnp.maximum(conv3x3(x, 0), 0.0)                  # conv1 + BN + ReLU
    z = conv3x3(y, 1)                                    # conv2 + BN (no act)

    o_ref[...] = jnp.maximum(z + x, 0.0).astype(o_ref.dtype)


# --------------------------- offline weight preparation ------------------------
def _build_banded(w_hwio, W):
    """Fold the kw taps + channel mix of a 3x3 conv into 3 banded matrices.

    M[kh][w_in*C + ci, w*C + co] = w_hwio[kh, w_in - w + 1, ci, co] for
    |w_in - w| <= 1 (zero elsewhere), so that in the flattened (rows, W*C)
    layout:   out[r] = sum_kh  x_shifted_by_(kh-1)[r] @ M[kh].
    """
    Kh, Kw, Cin, Cout = w_hwio.shape
    F = W * Cin
    w_idx = jnp.arange(W)
    mats = []
    for kh in range(Kh):
        m = jnp.zeros((W, Cin, W, Cout), w_hwio.dtype)
        for kw in range(Kw):
            d = kw - 1                                   # w_in = w + d
            valid = ((w_idx + d >= 0) & (w_idx + d < W)).astype(w_hwio.dtype)
            sel = jnp.zeros((W, W), w_hwio.dtype).at[
                jnp.clip(w_idx + d, 0, W - 1), w_idx].add(valid)
            m = m + sel[:, None, :, None] * w_hwio[kh, kw][None, :, None, :]
        mats.append(m.reshape(F, F))
    return jnp.stack(mats, axis=0)                       # (3, F, F)


def prepare_params(w1_hwio, b1, w2_hwio, b2, W):
    """Done ONCE (at model-load / BN-fold time), not per forward call."""
    Cin = w1_hwio.shape[2]
    F = W * Cin
    m1 = _build_banded(w1_hwio, W).reshape(3 * F, F)     # fused [kh0; kh1; kh2]
    m2 = _build_banded(w2_hwio, W).reshape(3 * F, F)
    m = jnp.stack([m1, m2], axis=0).astype(jnp.bfloat16)  # (2, 3F, F) bf16
    b = jnp.stack([jnp.tile(b1.reshape(-1), (W,)),
                   jnp.tile(b2.reshape(-1), (W,))], axis=0).reshape(2, 1, F)
    return m, b.astype(jnp.float32)


# ----------------------------------- wrapper -----------------------------------
def sblock_forward(x_l_nhwc, x_v_nhwc, m, b):
    """SBlock forward.  Inputs/outputs are NHWC (keep the surrounding model in
    NHWC); m/b come from prepare_params()."""
    N, H, W, C = x_l_nhwc.shape
    F = W * C
    M = N * H

    # Free, contiguous reshapes to the lane-dense (N*H, W*C) layout.
    xl = x_l_nhwc.reshape(M, F)
    xv = x_v_nhwc.reshape(M, F)

    out_flat = pl.pallas_call(
        functools.partial(sblock_kernel, H),
        out_shape=jax.ShapeDtypeStruct((M, F), x_l_nhwc.dtype),
        grid_spec=pltpu.PrefetchScalarGridSpec(
            num_scalar_prefetch=0,
            grid=(1,),                                   # single step: whole batch
            in_specs=[
                pl.BlockSpec((M, F), lambda i: (0, 0)),
                pl.BlockSpec((M, F), lambda i: (0, 0)),
                pl.BlockSpec(m.shape, lambda i: (0, 0, 0)),
                pl.BlockSpec(b.shape, lambda i: (0, 0, 0)),
            ],
            out_specs=pl.BlockSpec((M, F), lambda i: (0, 0)),
        ),
        compiler_params=pltpu.CompilerParams(
            dimension_semantics=("arbitrary",)),
    )(xl, xv, m, b)

    return out_flat.reshape(N, H, W, C)


# ----------------------------- reference (pure JAX) -----------------------------
def _conv3x3_ref(x_nhwc, w_hwio, b):
    y = lax.conv_general_dilated(
        x_nhwc, w_hwio, window_strides=(1, 1), padding="SAME",
        dimension_numbers=("NHWC", "HWIO", "NHWC"),
        precision=lax.Precision.HIGHEST)
    return y + b.reshape(1, 1, 1, -1)


def sblock_ref(x_l, x_v, w1, b1, w2, b2):
    x = x_l + x_v
    res = x
    y = jnp.maximum(_conv3x3_ref(x, w1, b1), 0.0)
    z = _conv3x3_ref(y, w2, b2)
    return jnp.maximum(z + res, 0.0)


# ----------------------------- parameter construction ---------------------------
def make_params(C, key):
    k1, k2 = jax.random.split(key, 2)
    # PyTorch conv weights are OIHW; fold BN (inference, init state), convert
    # to HWIO for the kernel / reference.
    w1_oihw = jax.random.normal(k1, (C, C, 3, 3), jnp.float32) * 0.1
    w2_oihw = jax.random.normal(k2, (C, C, 3, 3), jnp.float32) * 0.1

    eps = 1e-5
    gamma = jnp.ones((C,), jnp.float32)
    beta = jnp.zeros((C,), jnp.float32)
    mean = jnp.zeros((C,), jnp.float32)
    var = jnp.ones((C,), jnp.float32)
    scale = gamma / jnp.sqrt(var + eps)               # per output channel

    def fuse(w_oihw):
        w_hwio = jnp.transpose(w_oihw, (2, 3, 1, 0))  # (kh, kw, Cin, Cout)
        w_fused = w_hwio * scale.reshape(1, 1, 1, C)
        b_fused = beta - mean * scale
        return w_fused, b_fused

    w1, b1 = fuse(w1_oihw)
    w2, b2 = fuse(w2_oihw)
    return w1, b1, w2, b2


if __name__ == "__main__":
    N, H, W, C = 2, 16, 16, 8
    key = jax.random.PRNGKey(0)
    kx, kv, kp = jax.random.split(key, 3)

    x_l = jax.random.normal(kx, (N, H, W, C), jnp.float32)   # NHWC
    x_v = jax.random.normal(kv, (N, H, W, C), jnp.float32)   # lateral input
    w1, b1, w2, b2 = make_params(C, kp)

    # Hoisted out of the per-call path (runs once, like the BN fold).
    m, b = prepare_params(w1, b1, w2, b2, W)

    fwd = jax.jit(sblock_forward)
    out = jax.block_until_ready(fwd(x_l, x_v, m, b))
    ref = jax.block_until_ready(sblock_ref(x_l, x_v, w1, b1, w2, b2))

    assert out.shape == (N, H, W, C)
    err = jnp.max(jnp.abs(out - ref))
    # bf16 MXU operands (f32 accumulation) vs the HIGHEST-precision f32 reference
    # -> looser tolerance than the pure-f32 path.
    assert jnp.allclose(out, ref, atol=5e-2, rtol=5e-2), f"max abs err {err}"

    print("KERNEL_OK")
</pallas_src>

<mosaic_0001>
module attributes {stable_mosaic.version = 11 : i64} {
  func.func @sblock_kernel(%arg0: i32, %arg1: memref<32x128xf32, #tpu.memory_space<vmem>>, %arg2: memref<32x128xf32, #tpu.memory_space<vmem>>, %arg3: memref<2x384x128xbf16, #tpu.memory_space<vmem>>, %arg4: memref<2x1x128xf32, #tpu.memory_space<vmem>>, %arg5: memref<32x128xf32, #tpu.memory_space<vmem>>) attributes {dimension_semantics = [#tpu.dimension_semantics<arbitrary>], iteration_bounds = array<i64: 1>, scalar_prefetch = 0 : i64, scratch_operands = 0 : i64, tpu.core_type = #tpu.core_type<tc>, window_params = [{pipeline_mode = #tpu.pipeline_mode<synchronous>, transform_indices = @transform_0, window_bounds = array<i64: 32, 128>}, {pipeline_mode = #tpu.pipeline_mode<synchronous>, transform_indices = @transform_1, window_bounds = array<i64: 32, 128>}, {pipeline_mode = #tpu.pipeline_mode<synchronous>, transform_indices = @transform_2, window_bounds = array<i64: 2, 384, 128>}, {pipeline_mode = #tpu.pipeline_mode<synchronous>, transform_indices = @transform_3, window_bounds = array<i64: 2, 1, 128>}, {pipeline_mode = #tpu.pipeline_mode<synchronous>, transform_indices = @transform_4, window_bounds = array<i64: 32, 128>}]} {
    %c0 = arith.constant 0 : index
    %c0_0 = arith.constant 0 : index
    %0 = vector.load %arg1[%c0, %c0_0] : memref<32x128xf32, #tpu.memory_space<vmem>>, vector<32x128xf32>
    %c0_1 = arith.constant 0 : index
    %c0_2 = arith.constant 0 : index
    %1 = vector.load %arg2[%c0_1, %c0_2] : memref<32x128xf32, #tpu.memory_space<vmem>>, vector<32x128xf32>
    %2 = arith.addf %0, %1 : vector<32x128xf32>
    %3 = tpu.iota {dimensions = array<i32: 0>} : vector<32x128xi32>
    %c16_i32 = arith.constant 16 : i32
    %c0_i32 = arith.constant 0 : i32
    %4 = arith.cmpi eq, %c16_i32, %c0_i32 : i32
    %c1_i32 = arith.constant 1 : i32
    %5 = arith.select %4, %c1_i32, %c16_i32 : i32
    %6 = vector.broadcast %5 : i32 to vector<32x128xi32>
    %7 = arith.remsi %3, %6 : vector<32x128xi32>
    %c0_i32_3 = arith.constant 0 : i32
    %8 = vector.broadcast %c0_i32_3 : i32 to vector<32x128xi32>
    %9 = arith.cmpi ne, %7, %8 : vector<32x128xi32>
    %c0_i32_4 = arith.constant 0 : i32
    %10 = vector.broadcast %c0_i32_4 : i32 to vector<32x128xi32>
    %11 = arith.cmpi slt, %7, %10 : vector<32x128xi32>
    %c0_i32_5 = arith.constant 0 : i32
    %12 = arith.cmpi slt, %5, %c0_i32_5 : i32
    %13 = vector.broadcast %12 : i1 to vector<32x128xi1>
    %14 = vector.broadcast %13 : vector<32x128xi1> to vector<32x128xi1>
    %15 = arith.xori %11, %14 : vector<32x128xi1>
    %16 = arith.andi %15, %9 : vector<32x128xi1>
    %17 = vector.broadcast %5 : i32 to vector<32x128xi32>
    %18 = arith.addi %7, %17 : vector<32x128xi32>
    %19 = arith.select %16, %18, %7 : vector<32x128xi1>, vector<32x128xi32>
    %c1_i32_6 = arith.constant 1 : i32
    %20 = vector.broadcast %c1_i32_6 : i32 to vector<32x128xi32>
    %21 = arith.cmpi sge, %19, %20 : vector<32x128xi32>
    %c14_i32 = arith.constant 14 : i32
    %22 = vector.broadcast %c14_i32 : i32 to vector<32x128xi32>
    %23 = arith.cmpi sle, %19, %22 : vector<32x128xi32>
    %c1_i32_7 = arith.constant 1 : i32
    %24 = tpu.dynamic_rotate %2 by %c1_i32_7 dim 0 : vector<32x128xf32>, i32 -> vector<32x128xf32>
    %cst = arith.constant 0.000000e+00 : f32
    %25 = vector.broadcast %cst : f32 to vector<32x128xf32>
    %26 = arith.select %21, %24, %25 : vector<32x128xi1>, vector<32x128xf32>
    %c31_i32 = arith.constant 31 : i32
    %27 = tpu.dynamic_rotate %2 by %c31_i32 dim 0 : vector<32x128xf32>, i32 -> vector<32x128xf32>
    %cst_8 = arith.constant 0.000000e+00 : f32
    %28 = vector.broadcast %cst_8 : f32 to vector<32x128xf32>
    %29 = arith.select %23, %27, %28 : vector<32x128xi1>, vector<32x128xf32>
    %30 = tpu.concatenate %26, %2, %29 in 1 : vector<32x128xf32>, vector<32x128xf32>, vector<32x128xf32> -> vector<32x384xf32>
    %31 = arith.truncf %30 : vector<32x384xf32> to vector<32x384xbf16>
    %c0_9 = arith.constant 0 : index
    %c0_10 = arith.constant 0 : index
    %c0_11 = arith.constant 0 : index
    %32 = vector.load %arg3[%c0_9, %c0_10, %c0_11] : memref<2x384x128xbf16, #tpu.memory_space<vmem>>, vector<1x384x128xbf16>
    %33 = vector.shape_cast %32 : vector<1x384x128xbf16> to vector<384x128xbf16>
    %cst_12 = arith.constant dense<0.000000e+00> : vector<32x128xf32>
    %34 = tpu.matmul %31, %33, %cst_12 {dimension_numbers = #tpu.dot_dimension_numbers<[1], [0], [0], [1], [0, 0, 1, 1], [], []>} : vector<32x384xbf16>, vector<384x128xbf16>, vector<32x128xf32> -> vector<32x128xf32>
    %c0_13 = arith.constant 0 : index
    %c0_14 = arith.constant 0 : index
    %c0_15 = arith.constant 0 : index
    %35 = vector.load %arg4[%c0_13, %c0_14, %c0_15] : memref<2x1x128xf32, #tpu.memory_space<vmem>>, vector<1x1x128xf32>
    %36 = vector.shape_cast %35 : vector<1x1x128xf32> to vector<1x128xf32>
    %37 = vector.broadcast %36 : vector<1x128xf32> to vector<32x128xf32>
    %38 = arith.addf %34, %37 : vector<32x128xf32>
    %cst_16 = arith.constant 0.000000e+00 : f32
    %39 = vector.broadcast %cst_16 : f32 to vector<32x128xf32>
    %40 = arith.maximumf %38, %39 : vector<32x128xf32>
    %c1_i32_17 = arith.constant 1 : i32
    %41 = tpu.dynamic_rotate %40 by %c1_i32_17 dim 0 : vector<32x128xf32>, i32 -> vector<32x128xf32>
    %cst_18 = arith.constant 0.000000e+00 : f32
    %42 = vector.broadcast %cst_18 : f32 to vector<32x128xf32>
    %43 = arith.select %21, %41, %42 : vector<32x128xi1>, vector<32x128xf32>
    %c31_i32_19 = arith.constant 31 : i32
    %44 = tpu.dynamic_rotate %40 by %c31_i32_19 dim 0 : vector<32x128xf32>, i32 -> vector<32x128xf32>
    %cst_20 = arith.constant 0.000000e+00 : f32
    %45 = vector.broadcast %cst_20 : f32 to vector<32x128xf32>
    %46 = arith.select %23, %44, %45 : vector<32x128xi1>, vector<32x128xf32>
    %47 = tpu.concatenate %43, %40, %46 in 1 : vector<32x128xf32>, vector<32x128xf32>, vector<32x128xf32> -> vector<32x384xf32>
    %48 = arith.truncf %47 : vector<32x384xf32> to vector<32x384xbf16>
    %c1 = arith.constant 1 : index
    %c0_21 = arith.constant 0 : index
    %c0_22 = arith.constant 0 : index
    %49 = vector.load %arg3[%c1, %c0_21, %c0_22] : memref<2x384x128xbf16, #tpu.memory_space<vmem>>, vector<1x384x128xbf16>
    %50 = vector.shape_cast %49 : vector<1x384x128xbf16> to vector<384x128xbf16>
    %cst_23 = arith.constant dense<0.000000e+00> : vector<32x128xf32>
    %51 = tpu.matmul %48, %50, %cst_23 {dimension_numbers = #tpu.dot_dimension_numbers<[1], [0], [0], [1], [0, 0, 1, 1], [], []>} : vector<32x384xbf16>, vector<384x128xbf16>, vector<32x128xf32> -> vector<32x128xf32>
    %c1_24 = arith.constant 1 : index
    %c0_25 = arith.constant 0 : index
    %c0_26 = arith.constant 0 : index
    %52 = vector.load %arg4[%c1_24, %c0_25, %c0_26] : memref<2x1x128xf32, #tpu.memory_space<vmem>>, vector<1x1x128xf32>
    %53 = vector.shape_cast %52 : vector<1x1x128xf32> to vector<1x128xf32>
    %54 = vector.broadcast %53 : vector<1x128xf32> to vector<32x128xf32>
    %55 = arith.addf %51, %54 : vector<32x128xf32>
    %56 = arith.addf %55, %2 : vector<32x128xf32>
    %cst_27 = arith.constant 0.000000e+00 : f32
    %57 = vector.broadcast %cst_27 : f32 to vector<32x128xf32>
    %58 = arith.maximumf %56, %57 : vector<32x128xf32>
    %c0_28 = arith.constant 0 : index
    %c0_29 = arith.constant 0 : index
    %59 = vector.load %arg5[%c0_28, %c0_29] : memref<32x128xf32, #tpu.memory_space<vmem>>, vector<32x128xf32>
    tpu.vector_store %arg5[%c0_28, %c0_29], %58 {strides = array<i32>} : memref<32x128xf32, #tpu.memory_space<vmem>>, vector<32x128xf32>,
    return
  }
  func.func @transform_0(%arg0: i32) -> (i32, i32) {
    %c0_i32 = arith.constant 0 : i32
    %c0_i32_0 = arith.constant 0 : i32
    %c0_i32_1 = arith.constant 0 : i32
    return %c0_i32, %c0_i32_0 : i32, i32
  }
  func.func @transform_1(%arg0: i32) -> (i32, i32) {
    %c0_i32 = arith.constant 0 : i32
    %c0_i32_0 = arith.constant 0 : i32
    %c0_i32_1 = arith.constant 0 : i32
    return %c0_i32, %c0_i32_0 : i32, i32
  }
  func.func @transform_2(%arg0: i32) -> (i32, i32, i32) {
    %c0_i32 = arith.constant 0 : i32
    %c0_i32_0 = arith.constant 0 : i32
    %c0_i32_1 = arith.constant 0 : i32
    %c0_i32_2 = arith.constant 0 : i32
    return %c0_i32, %c0_i32_0, %c0_i32_1 : i32, i32, i32
  }
  func.func @transform_3(%arg0: i32) -> (i32, i32, i32) {
    %c0_i32 = arith.constant 0 : i32
    %c0_i32_0 = arith.constant 0 : i32
    %c0_i32_1 = arith.constant 0 : i32
    %c0_i32_2 = arith.constant 0 : i32
    return %c0_i32, %c0_i32_0, %c0_i32_1 : i32, i32, i32
  }
  func.func @transform_4(%arg0: i32) -> (i32, i32) {
    %c0_i32 = arith.constant 0 : i32
    %c0_i32_0 = arith.constant 0 : i32
    %c0_i32_1 = arith.constant 0 : i32
    return %c0_i32, %c0_i32_0 : i32, i32
  }
}

</mosaic_0001>

<bundles_post_ra>
// kernel: sblock_forward.1
= control target key start
LH: loop header
LB: loop body
LE: loop exit
PB: predicated region body
PF: predicated region fallthrough
CT: control target
= control target key end

     0   :  { %v29_v12 = vlaneseq  ;;  %vm1012_vm4 = vmmov 1   ;;  %s1324_s2 = inlined_call_operand.vmem [shape: bf16[2,384,128], index: 2, kind: input, shape index: {}]   ;;  %s1325_s3 = inlined_call_operand.vmem [shape: f32[2,1,128], index: 3, kind: input, shape index: {}]   ;;  %s1326_s0 = inlined_call_operand.vmem [shape: f32[32,128], index: 0, kind: input, shape index: {}]   ;;  %s1327_s1 = inlined_call_operand.vmem [shape: f32[32,128], index: 1, kind: input, shape index: {}]   ;;  %s1328_s4 = inlined_call_operand.vmem [shape: f32[32,128], index: 4, kind: output, shape index: {}]  }
   0x1   :  { %v952_v0 = vld [vmem:[%s1324_s2 + $0x38] sm:$0xff]  ;;  %v951_v3 = vld [vmem:[%s1324_s2 + $0x30] sm:$0xff]  ;;  %v950_v6 = vld [vmem:[%s1324_s2 + $0x28] sm:$0xff] }
   0x2   :  { %v960_v1 = vld [vmem:[%s1324_s2 + $0x78] sm:$0xff]  ;;  %318 = vmatpush.bf16.msra.mxu0 %v952_v0  ;;  %v959_v4 = vld [vmem:[%s1324_s2 + $0x70] sm:$0xff]  ;;  %v958_v7 = vld [vmem:[%s1324_s2 + $0x68] sm:$0xff]  ;;  %v1101_v22 = vshrl.u32 %v29_v12, 7 }
   0x3   :  { %v968_v2 = vld [vmem:[%s1324_s2 + $0xb8] sm:$0xff]  ;;  %337 = vmatpush.bf16.msra.mxu1 %v960_v1  ;;  %v967_v5 = vld [vmem:[%s1324_s2 + $0xb0] sm:$0xff]  ;;  %v966_v8 = vld [vmem:[%s1324_s2 + $0xa8] sm:$0xff] }
   0x4   :  { %356 = vmatpush.bf16.msra.mxu2 %v968_v2  ;;  %v949_v9 = vld [vmem:[%s1324_s2 + $0x20] sm:$0xff]  ;;  %v948_v13 = vld [vmem:[%s1324_s2 + $0x18] sm:$0xff]  ;;  %v18_v17 = vld [vmem:[%s1326_s0 + $0x8] sm:$0xff]  ;;  %v31_v32 = vadd.s32 8, %v1101_v22  ;;  %v38_v35 = vand.u32 15, %v1101_v22  ;;  %vm94_vm0 = vcmp.lt.s32.totalorder %v1101_v22, 1 }
   0x5   :  { %v957_v10 = vld [vmem:[%s1324_s2 + $0x60] sm:$0xff]  ;;  %v956_v14 = vld [vmem:[%s1324_s2 + $0x58] sm:$0xff]  ;;  %v22_v20 = vld [vmem:[%s1327_s1 + $0x8] sm:$0xff]  ;;  %vm107_vm1 = vcmp.lt.s32.totalorder %v1101_v22, 7  ;;  %v32_v58 = vadd.s32 16, %v1101_v22  ;;  %v33_v60 = vadd.s32 24, %v1101_v22 }
   0x6   :  { %319 = vmatpush.bf16.msra.mxu0 %v951_v3  ;;  %v965_v11 = vld [vmem:[%s1324_s2 + $0xa0] sm:$0xff]  ;;  %v964_v15 = vld [vmem:[%s1324_s2 + $0x98] sm:$0xff]  ;;  %v19_v23 = vld [vmem:[%s1326_s0 + $0x10] sm:$0xff]  ;;  %v1117_v28 = vadd.f32 %v22_v20, %v18_v17  ;;  %v45_v43 = vand.u32 15, %v31_v32  ;;  %vm82_vm2 = vcmp.ge.s32.totalorder %v38_v35, 1 }
   0x7   :  { %338 = vmatpush.bf16.msra.mxu1 %v959_v4  ;;  %v17_v16 = vld [vmem:[%s1326_s0] sm:$0xff]  ;;  %v20_v18 = vld [vmem:[%s1326_s0 + $0x18] sm:$0xff]  ;;  %v23_v24 = vld [vmem:[%s1327_s1 + $0x10] sm:$0xff]  ;;  %v52_v62 = vand.u32 15, %v32_v58  ;;  %v59_v0 = vand.u32 15, %v33_v60 }
   0x8   :  { %357 = vmatpush.bf16.msra.mxu2 %v967_v5  ;;  %v21_v19 = vld [vmem:[%s1327_s1] sm:$0xff]  ;;  %v24_v21 = vld [vmem:[%s1327_s1 + $0x18] sm:$0xff]  ;;  %v947_v25 = vld [vmem:[%s1324_s2 + $0x10] sm:$0xff]  ;;  %v1124_v31 = vadd.f32 %v23_v24, %v19_v23  ;;  %v91_v37 = vrot.slane %v1117_v28, 7  ;;  %v104_v41 = vrot.slane %v1117_v28, 1  ;;  %vm87_vm3 = vcmp.le.s32.totalorder %v45_v43, 14 }
   0x9   :  { %v955_v26 = vld [vmem:[%s1324_s2 + $0x50] sm:$0xff]  ;;  %v1115_v27 = vadd.f32 %v21_v19, %v17_v16  ;;  %v1119_v29 = vadd.f32 %v24_v21, %v20_v18  ;;  %v946_v33 = vld [vmem:[%s1324_s2 + $0x8] sm:$0xff]  ;;  %v945_v44 = vld [vmem:[%s1324_s2] sm:$0xff]  ;;  %vm84_vm7 = vcmp.ge.s32.totalorder %v52_v62, 1  ;;  %vm89_vm8 = vcmp.le.s32.totalorder %v59_v0, 14 }
   0xa   :  { %320 = vmatpush.bf16.msra.mxu0 %v950_v6  ;;  %v963_v30 = vld [vmem:[%s1324_s2 + $0x90] sm:$0xff]  ;;  %v954_v34 = vld [vmem:[%s1324_s2 + $0x48] sm:$0xff]  ;;  %v105_v42 = vrot.slane %v1124_v31, 1  ;;  %v953_v45 = vld [vmem:[%s1324_s2 + $0x40] sm:$0xff]  ;;  %v92_v61 = vrot.slane %v1124_v31, 7 }
   0xb   :  { %339 = vmatpush.bf16.msra.mxu1 %v958_v7  ;;  %v90_v36 = vrot.slane %v1115_v27, 7  ;;  %v93_v38 = vrot.slane %v1119_v29, 7  ;;  %v962_v39 = vld [vmem:[%s1324_s2 + $0x88] sm:$0xff]  ;;  %v103_v40 = vrot.slane %v1115_v27, 1  ;;  %v961_v48 = vld [vmem:[%s1324_s2 + $0x80] sm:$0xff]  ;;  %v984_v51 = vld [vmem:[%s1324_s2 + $0x138] sm:$0xff]  ;;  %v117_v53 = vpack.c.bf16 %v1117_v28, %v1115_v27 }
   0xc   :  { %358 = vmatpush.bf16.msra.mxu2 %v966_v8  ;;  %v109_v49 = vsel %vm107_vm1, %v104_v41, %v105_v42  ;;  %vm1168_vm5 = vmpackc.low %vm1012_vm4, %vm82_vm2  ;;  %v983_v57 = vld [vmem:[%s1324_s2 + $0x130] sm:$0xff]  ;;  %v982_v59 = vld [vmem:[%s1324_s2 + $0x128] sm:$0xff]  ;;  %v106_v63 = vrot.slane %v1119_v29, 1  ;;  %v96_v2 = vsel %vm94_vm0, %v91_v37, %v92_v61  ;;  %v120_v6 = vpack.c.bf16 %v1119_v29, %v1124_v31 }
   0xd   :  { %v97_v46 = vsel %vm94_vm0, %v90_v36, %v91_v37  ;;  %v98_v47 = vsel %vm94_vm0, %v93_v38, %v90_v36  ;;  %v110_v50 = vsel %vm107_vm1, %v103_v40, %v104_v41  ;;  %vm1173_vm6 = vmpackc.low %vm87_vm3, %vm1012_vm4  ;;  %v95_v1 = vsel %vm94_vm0, %v92_v61, %v93_v38  ;;  %v991_v12 = vld [vmem:[%s1324_s2 + $0x170] sm:$0xff]  ;;  %v989_v18 = vld [vmem:[%s1324_s2 + $0x160] sm:$0xff] }
   0xe   :  { %321 = vmatpush.bf16.msra.mxu0 %v949_v9  ;;  %v777_v52 = vpack.c.bf16 %v97_v46, %v98_v47  ;;  %v783_v55 = vpack.c.bf16 %v109_v49, %v110_v50  ;;  %v108_v3 = vsel %vm107_vm1, %v105_v42, %v106_v63  ;;  %v111_v4 = vsel %vm107_vm1, %v106_v63, %v103_v40  ;;  %vm1202_vm9 = vmpackc.low %vm1012_vm4, %vm84_vm7  ;;  %v979_v16 = vld [vmem:[%s1324_s2 + $0x110] sm:$0xff]  ;;  %v978_v19 = vld [vmem:[%s1324_s2 + $0x108] sm:$0xff] }
   0xf   :  { %340 = vmatpush.bf16.msra.mxu1 %v957_v10  ;;  %v780_v5 = vpack.c.bf16 %v95_v1, %v96_v2  ;;  %v786_v8 = vpack.c.bf16 %v111_v4, %v108_v3  ;;  %vm1207_vm10 = vmpackc.low %vm89_vm8, %vm1012_vm4  ;;  %v992_v10 = vld [vmem:[%s1324_s2 + $0x178] sm:$0xff]  ;;  %v975_v17 = vld [vmem:[%s1324_s2 + $0xf0] sm:$0xff] }
  0x10   :  { %359 = vmatpush.bf16.msra.mxu2 %v965_v11  ;;  %v981_v11 = vld [vmem:[%s1324_s2 + $0x120] sm:$0xff]  ;;  %v974_v20 = vld [vmem:[%s1324_s2 + $0xe8] sm:$0xff]  ;;  %v988_v21 = vld [vmem:[%s1324_s2 + $0x158] sm:$0xff] }
  0x11   :  { %v977_v23 = vld [vmem:[%s1324_s2 + $0x100] sm:$0xff]  ;;  %v971_v32 = vld [vmem:[%s1324_s2 + $0xd0] sm:$0xff]  ;;  %v970_v36 = vld [vmem:[%s1324_s2 + $0xc8] sm:$0xff] }
  0x12   :  { %322 = vmatpush.bf16.msra.mxu0 %v948_v13  ;;  %v980_v13 = vld [vmem:[%s1324_s2 + $0x118] sm:$0xff]  ;;  %v973_v24 = vld [vmem:[%s1324_s2 + $0xe0] sm:$0xff] }
  0x13   :  { %341 = vmatpush.bf16.msra.mxu1 %v956_v14  ;;  %v976_v14 = vld [vmem:[%s1324_s2 + $0xf8] sm:$0xff]  ;;  %v1010_v37 = vld [vmem:[%s1325_s3] ss:$0 sm:$0xff] }
  0x14   :  { %360 = vmatpush.bf16.msra.mxu2 %v964_v15  ;;  %v990_v15 = vld [vmem:[%s1324_s2 + $0x168] sm:$0xff]  ;;  %607 = vmatpush.bf16.msra.mxu3 %v976_v14  ;;  %v969_v38 = vld [vmem:[%s1324_s2 + $0xc0] sm:$0xff] }
  0x16   :  { %323 = vmatpush.bf16.msra.mxu0 %v947_v25  ;;  %v987_v25 = vld [vmem:[%s1324_s2 + $0x150] sm:$0xff] }
  0x17   :  { %342 = vmatpush.bf16.msra.mxu1 %v955_v26  ;;  %v972_v26 = vld [vmem:[%s1324_s2 + $0xd8] sm:$0xff] }
  0x18   :  { %361 = vmatpush.bf16.msra.mxu2 %v963_v30  ;;  %608 = vmatpush.bf16.msra.mxu3 %v975_v17  ;;  %v986_v30 = vld [vmem:[%s1324_s2 + $0x148] sm:$0xff] }
  0x1a   :  { %324 = vmatpush.bf16.msra.mxu0 %v946_v33  ;;  %v985_v33 = vld [vmem:[%s1324_s2 + $0x140] sm:$0xff] }
  0x1b   :  { %343 = vmatpush.bf16.msra.mxu1 %v954_v34 }
  0x1c   :  { %362 = vmatpush.bf16.msra.mxu2 %v962_v39  ;;  %609 = vmatpush.bf16.msra.mxu3 %v974_v20 }
  0x1e   :  { %325 = vmatpush.bf16.msra.mxu0 %v945_v44 }
  0x1f   :  { %344 = vmatpush.bf16.msra.mxu1 %v953_v45 }
  0x20   :  { %363 = vmatpush.bf16.msra.mxu2 %v961_v48  ;;  %610 = vmatpush.bf16.msra.mxu3 %v973_v24 }
  0x21   :  { %778 = vmatmul.msk.bf16.vlgmr.msra.gmra.mxu0 %vm1168_vm5, %v777_v52 }
  0x22   :  { %626 = vmatpush.bf16.msrb.mxu0 %v984_v51  ;;  %345 = vmatmul.bf16.vlgmr.msra.gmra.mxu1 %v117_v53 }
  0x23   :  { %784 = vmatmul.msk.bf16.vlgmr.msra.gmra.mxu2 %vm1173_vm6, %v783_v55  ;;  %645 = vmatpush.bf16.msrb.mxu1 %v992_v10 }
  0x24   :  { %993 = vmatpush.bf16.msrb.mxu2 %v984_v51  ;;  %611 = vmatpush.bf16.msra.mxu3 %v972_v26  ;;  %v1011_v26 = vld [vmem:[%s1325_s3 + $0x1] ss:$0 sm:$0xff] }
  0x26   :  { %627 = vmatpush.bf16.msrb.mxu0 %v983_v57 }
  0x27   :  { %646 = vmatpush.bf16.msrb.mxu1 %v991_v12 }
  0x28   :  { %994 = vmatpush.bf16.msrb.mxu2 %v983_v57  ;;  %612 = vmatpush.bf16.msra.mxu3 %v971_v32 }
  0x2a   :  { %628 = vmatpush.bf16.msrb.mxu0 %v982_v59 }
  0x2b   :  { %647 = vmatpush.bf16.msrb.mxu1 %v990_v15 }
  0x2c   :  { %995 = vmatpush.bf16.msrb.mxu2 %v982_v59  ;;  %613 = vmatpush.bf16.msra.mxu3 %v970_v36 }
  0x2e   :  { %629 = vmatpush.bf16.msrb.mxu0 %v981_v11 }
  0x2f   :  { %648 = vmatpush.bf16.msrb.mxu1 %v989_v18 }
  0x30   :  { %996 = vmatpush.bf16.msrb.mxu2 %v981_v11  ;;  %614 = vmatpush.bf16.msra.mxu3 %v969_v38 }
  0x31   :  { %781 = vmatmul.msk.bf16.gmra.mxu0 %vm1202_vm9, %v780_v5 }
  0x32   :  { %350 = vmatmul.bf16.gmra.mxu1 %v120_v6  ;;  %630 = vmatpush.bf16.msrb.mxu0 %v980_v13 }
  0x33   :  { %787 = vmatmul.msk.bf16.gmra.mxu2 %vm1207_vm10, %v786_v8  ;;  %649 = vmatpush.bf16.msrb.mxu1 %v988_v21 }
  0x34   :  { %997 = vmatpush.bf16.msrb.mxu2 %v980_v13  ;;  %1001 = vmatpush.bf16.msrb.mxu3 %v992_v10 }
  0x36   :  { %631 = vmatpush.bf16.msrb.mxu0 %v979_v16 }
  0x37   :  { %650 = vmatpush.bf16.msrb.mxu1 %v987_v25 }
  0x38   :  { %998 = vmatpush.bf16.msrb.mxu2 %v979_v16  ;;  %1002 = vmatpush.bf16.msrb.mxu3 %v991_v12 }
  0x3a   :  { %632 = vmatpush.bf16.msrb.mxu0 %v978_v19 }
  0x3b   :  { %651 = vmatpush.bf16.msrb.mxu1 %v986_v30 }
  0x3c   :  { %999 = vmatpush.bf16.msrb.mxu2 %v978_v19  ;;  %1003 = vmatpush.bf16.msrb.mxu3 %v990_v15 }
  0x3e   :  { %633 = vmatpush.bf16.msrb.mxu0 %v977_v23 }
  0x3f   :  { %652 = vmatpush.bf16.msrb.mxu1 %v985_v33 }
  0x40   :  { %1000 = vmatpush.bf16.msrb.mxu2 %v977_v23  ;;  %1004 = vmatpush.bf16.msrb.mxu3 %v989_v18 }
  0x44   :  { %1005 = vmatpush.bf16.msrb.mxu3 %v988_v21 }
  0x48   :  { %1006 = vmatpush.bf16.msrb.mxu3 %v987_v25 }
  0x4c   :  { %1007 = vmatpush.bf16.msrb.mxu3 %v986_v30 }
  0x50   :  { %1008 = vmatpush.bf16.msrb.mxu3 %v985_v33 }
  0x9e   :  { %v327_v34 = vpop.f32.mrf.mxu0 }
  0x9f   :  { %v346_v35 = vpop.f32.mrf.mxu1  ;;  %v328_v39 = vadd.f32 %v1010_v37, %v327_v34 }
  0xa1   :  { %v347_v43 = vadd.f32 %v346_v35, %v328_v39 }
  0xa6   :  { %v365_v40 = vpop.f32.mrf.mxu2  ;;  %v329_v41 = vpop.f32.mrf.mxu0 }
  0xa7   :  { %v348_v42 = vpop.f32.mrf.mxu1  ;;  %v330_v44 = vadd.f32 %v1010_v37, %v329_v41  ;;  %v366_v45 = vadd.f32 %v365_v40, %v347_v43 }
  0xa9   :  { %v349_v46 = vadd.f32 %v348_v42, %v330_v44  ;;  %v375_v51 = vmax.f32 %v366_v45, 0.0 }
  0xab   :  { %v391_v0 = vrot.slane %v375_v51, 1  ;;  %v379_v13 = vrot.slane %v375_v51, 7 }
  0xae   :  { %v367_v47 = vpop.f32.mrf.mxu2  ;;  %v332_v49 = vpop.f32.mrf.mxu0 }
  0xaf   :  { %v368_v48 = vadd.f32 %v367_v47, %v349_v46  ;;  %v333_v50 = vadd.f32 %v1010_v37, %v332_v49  ;;  %v351_v53 = vpop.f32.mrf.mxu1 }
  0xb1   :  { %v376_v52 = vmax.f32 %v368_v48, 0.0  ;;  %v352_v55 = vadd.f32 %v351_v53, %v333_v50 }
  0xb3   :  { %v404_v57 = vpack.c.bf16 %v376_v52, %v375_v51  ;;  %v392_v61 = vrot.slane %v376_v52, 1  ;;  %v380_v11 = vrot.slane %v376_v52, 7 }
  0xb5   :  { %634 = vmatmul.bf16.vlgmr.msrb.gmra.mxu0 %v404_v57  ;;  %v397_v5 = vsel %vm107_vm1, %v391_v0, %v392_v61  ;;  %v385_v16 = vsel %vm94_vm0, %v379_v13, %v380_v11 }
  0xb6   :  { %v370_v58 = vpop.f32.mrf.mxu2  ;;  %v334_v60 = vpop.f32.mrf.mxu0 }
  0xb7   :  { %v371_v59 = vadd.f32 %v370_v58, %v352_v55  ;;  %v335_v63 = vadd.f32 %v1010_v37, %v334_v60  ;;  %v353_v2 = vpop.f32.mrf.mxu1 }
  0xb9   :  { %v377_v62 = vmax.f32 %v371_v59, 0.0  ;;  %v354_v3 = vadd.f32 %v353_v2, %v335_v63 }
  0xbb   :  { %v393_v1 = vrot.slane %v377_v62, 1  ;;  %v381_v19 = vrot.slane %v377_v62, 7 }
  0xbd   :  { %v396_v4 = vsel %vm107_vm1, %v392_v61, %v393_v1  ;;  %v384_v20 = vsel %vm94_vm0, %v380_v11, %v381_v19 }
  0xbe   :  { %v372_v6 = vpop.f32.mrf.mxu2  ;;  %v940_v8 = vpack.c.bf16 %v396_v4, %v397_v5 }
  0xbf   :  { %v373_v10 = vadd.f32 %v372_v6, %v354_v3 }
  0xc0   :  { %941 = vmatmul.msk.bf16.vlgmr.msrb.gmra.mxu1 %vm1173_vm6, %v940_v8 }
  0xc1   :  { %v378_v12 = vmax.f32 %v373_v10, 0.0 }
  0xc3   :  { %v382_v14 = vrot.slane %v378_v12, 7  ;;  %v407_v15 = vpack.c.bf16 %v378_v12, %v377_v62  ;;  %v394_v23 = vrot.slane %v378_v12, 1 }
  0xc5   :  { %639 = vmatmul.bf16.vlgmr.msrb.gmra.mxu2 %v407_v15  ;;  %v386_v17 = vsel %vm94_vm0, %v382_v14, %v379_v13  ;;  %v383_v56 = vsel %vm94_vm0, %v381_v19, %v382_v14  ;;  %v395_v24 = vsel %vm107_vm1, %v393_v1, %v394_v23  ;;  %v398_v25 = vsel %vm107_vm1, %v394_v23, %v391_v0 }
  0xc6   :  { %v934_v18 = vpack.c.bf16 %v385_v16, %v386_v17  ;;  %v937_v21 = vpack.c.bf16 %v383_v56, %v384_v20  ;;  %v943_v54 = vpack.c.bf16 %v398_v25, %v395_v24 }
  0xc8   :  { %935 = vmatmul.msk.bf16.vlgmr.msra.gmra.mxu3 %vm1168_vm5, %v934_v18 }
  0xd8   :  { %938 = vmatmul.msk.bf16.gmra.mxu3 %vm1202_vm9, %v937_v21 }
  0xe8   :  { %944 = vmatmul.msk.bf16.vlgmr.msrb.gmra.mxu3 %vm1207_vm10, %v943_v54 }
 0x132   :  { %v635_v30 = vpop.f32.mrf.mxu0 }
 0x13a   :  { %v637_v39 = vpop.f32.mrf.mxu0 }
 0x13d   :  { %v654_v7 = vpop.f32.mrf.mxu1 }
 0x145   :  { %v656_v40 = vpop.f32.mrf.mxu1 }
 0x148   :  { %v640_v46 = vpop.f32.mrf.mxu2 }
 0x14b   :  { %v616_v32 = vpop.f32.mrf.mxu3 }
 0x14c   :  { %v617_v33 = vadd.f32 %v1011_v26, %v616_v32 }
 0x14e   :  { %v636_v34 = vadd.f32 %v635_v30, %v617_v33 }
 0x150   :  { %v655_v35 = vadd.f32 %v654_v7, %v636_v34  ;;  %v642_v53 = vpop.f32.mrf.mxu2 }
 0x152   :  { %v664_v36 = vadd.f32 %v655_v35, %v1115_v27 }
 0x153   :  { %v618_v37 = vpop.f32.mrf.mxu3 }
 0x154   :  { %v668_v38 = vmax.f32 %v664_v36, 0.0  ;;  %v619_v22 = vadd.f32 %v1011_v26, %v618_v37 }
 0x156   :  { %672 = vst [vmem:[%s1328_s4] sm:$0xff] %v668_v38  ;;  %v638_v9 = vadd.f32 %v637_v39, %v619_v22 }
 0x158   :  { %v657_v41 = vadd.f32 %v656_v40, %v638_v9 }
 0x15a   :  { %v665_v42 = vadd.f32 %v657_v41, %v1117_v28 }
 0x15b   :  { %v621_v43 = vpop.f32.mrf.mxu3 }
 0x15c   :  { %v669_v44 = vmax.f32 %v665_v42, 0.0  ;;  %v622_v45 = vadd.f32 %v1011_v26, %v621_v43 }
 0x15e   :  { %673 = vst [vmem:[%s1328_s4 + $0x8] sm:$0xff] %v669_v44  ;;  %v641_v47 = vadd.f32 %v640_v46, %v622_v45 }
 0x163   :  { %v623_v27 = vpop.f32.mrf.mxu3 }
 0x164   :  { %v624_v50 = vadd.f32 %v1011_v26, %v623_v27 }
 0x166   :  { %v643_v28 = vadd.f32 %v642_v53, %v624_v50 }
 0x16b   :  { %v659_v48 = vpop.f32.mrf.mxu3 }
 0x16c   :  { %v660_v49 = vadd.f32 %v659_v48, %v641_v47 }
 0x16e   :  { %v666_v51 = vadd.f32 %v660_v49, %v1124_v31 }
 0x170   :  { %v670_v52 = vmax.f32 %v666_v51, 0.0 }
 0x172   :  { %674 = vst [vmem:[%s1328_s4 + $0x10] sm:$0xff] %v670_v52 }
 0x173   :  { %v661_v55 = vpop.f32.mrf.mxu3 }
 0x174   :  { %v662_v57 = vadd.f32 %v661_v55, %v643_v28 }
 0x176   :  { %v667_v58 = vadd.f32 %v662_v57, %v1119_v29 }
 0x178   :  { %v671_v59 = vmax.f32 %v667_v58, 0.0 }
 0x17a   :  { %675 = vst [vmem:[%s1328_s4 + $0x18] sm:$0xff] %v671_v59 }

</bundles_post_ra>
